<compile_context>
chip_gen: v7x
topology: tpu7x:2x2x1
jax: 0.10.0
libtpu: 0.0.40
codegen_flags: <defaults>
</compile_context>

<pallas_src>
import math

import jax
import jax.numpy as jnp
from jax.experimental import pallas as pl
from jax.experimental.pallas import tpu as pltpu

_LANES = 128


def _cdiv(a, b):
    return (a + b - 1) // b


def _round_up(a, b):
    return _cdiv(a, b) * b


def _dist_loss_kernel(scores_ref, labels_ref, mask_ref, out_ref):
    """One grid step: (1, tr, 128) tile of one batch element.

    Accumulates per-lane partials into a resident (1, 2, 128) output block:
      out[0, 0, :] += sum_rows(mask * |scores - labels|)
      out[0, 1, :] += sum_rows(mask)
    """
    t = pl.program_id(1)

    @pl.when(t == 0)
    def _init():
        out_ref[...] = jnp.zeros_like(out_ref)

    m = mask_ref[0]                                   # (tr, 128) f32
    d = jnp.abs(scores_ref[0] - labels_ref[0])        # (tr, 128) f32
    out_ref[0, 0, :] += jnp.sum(m * d, axis=0)        # per-lane masked L1
    out_ref[0, 1, :] += jnp.sum(m, axis=0)            # per-lane mask sum


def distance_matrix_loss(scores, labels, mask, *, block_rows=4096):
    """Pallas wrapper. scores/labels/mask: (B, ...) same shape -> scalar f32.

    block_rows=4096 -> 4096*128*4B = 2 MiB per input block per step; with
    3 inputs x 2 pipeline buffers that is ~12 MiB resident VMEM (safe on all
    TPU generations, incl. v7x's 64 MiB physical VMEM).
    """
    B = scores.shape[0]
    n = math.prod(scores.shape[1:])

    rows = _cdiv(n, _LANES)
    n_tiles = _cdiv(rows, block_rows)
    tr = _round_up(_cdiv(rows, n_tiles), 8)           # tile height, mult. of 8
    rows_pad = tr * n_tiles
    n_pad = rows_pad * _LANES

    def prep(x):
        x = x.reshape(B, n).astype(jnp.float32)
        if n_pad != n:
            x = jnp.pad(x, ((0, 0), (0, n_pad - n)))  # zero pad (mask=0 there)
        return x.reshape(B, rows_pad, _LANES)

    scores_f = prep(scores)
    labels_f = prep(labels)
    mask_f = prep(mask)

    in_spec = pl.BlockSpec((1, tr, _LANES), lambda b, t: (b, t, 0))
    out_spec = pl.BlockSpec((1, 2, _LANES), lambda b, t: (b, 0, 0))

    partials = pl.pallas_call(
        _dist_loss_kernel,
        out_shape=jax.ShapeDtypeStruct((B, 2, _LANES), jnp.float32),
        grid_spec=pltpu.PrefetchScalarGridSpec(
            num_scalar_prefetch=0,
            grid=(B, n_tiles),
            in_specs=[in_spec, in_spec, in_spec],
            out_specs=out_spec,
        ),
        compiler_params=pltpu.CompilerParams(
            # batch axis independent -> parallel (megacore on v7x);
            # tile axis is the reduction over a resident output block.
            dimension_semantics=("parallel", "arbitrary"),
            # Raise the scoped-VMEM limit above the v5e/v6e defaults while
            # leaving headroom under v7x's 64 MiB physical VMEM.
            vmem_limit_bytes=48 * 1024 * 1024,
        ),
    )(scores_f, labels_f, mask_f)

    # Finish the tiny reductions / division / mean in plain JAX.
    l1 = jnp.sum(partials[:, 0, :], axis=-1)          # (B,)
    sq = jnp.sum(partials[:, 1, :], axis=-1)          # (B,)
    # NOTE: matches PyTorch — an all-zero mask for a batch element yields
    # NaN/Inf in the mean (documented precondition: mask must be nonzero).
    return jnp.mean(l1 / sq)


def _reference(scores, labels, mask):
    B = scores.shape[0]
    sq_lengths = mask.reshape(B, -1).sum(1)
    l1_diff = (mask * jnp.abs(scores - labels)).reshape(B, -1).sum(1)
    return jnp.mean(l1_diff / sq_lengths)


if __name__ == "__main__":
    key = jax.random.PRNGKey(0)

    # Case 1: small square distance matrices (B, S, S), like the module's use.
    B, S = 2, 16
    k1, k2, k3, key = jax.random.split(key, 4)
    scores = jax.random.normal(k1, (B, S, S), dtype=jnp.float32)
    labels = jax.random.normal(k2, (B, S, S), dtype=jnp.float32)
    mask = (jax.random.uniform(k3, (B, S, S)) > 0.3).astype(jnp.float32)
    mask = mask.at[:, 0, 0].set(1.0)  # ensure nonzero mask per batch

    loss = distance_matrix_loss(scores, labels, mask)
    loss = jax.block_until_ready(loss)
    ref = _reference(scores, labels, mask)
    assert jnp.allclose(loss, ref, rtol=1e-5, atol=1e-5), (loss, ref)

    # Case 2: odd batch / non-multiple sizes to exercise padding path.
    B2, S2 = 3, 24
    k1, k2, k3, key = jax.random.split(key, 4)
    scores2 = jax.random.normal(k1, (B2, S2, S2), dtype=jnp.float32)
    labels2 = jax.random.normal(k2, (B2, S2, S2), dtype=jnp.float32)
    mask2 = (jax.random.uniform(k3, (B2, S2, S2)) > 0.5).astype(jnp.float32)
    mask2 = mask2.at[:, 0, 0].set(1.0)

    loss2 = distance_matrix_loss(scores2, labels2, mask2)
    loss2 = jax.block_until_ready(loss2)
    ref2 = _reference(scores2, labels2, mask2)
    assert jnp.allclose(loss2, ref2, rtol=1e-5, atol=1e-5), (loss2, ref2)

    print("KERNEL_OK")
</pallas_src>

<mosaic_0001>
module attributes {stable_mosaic.version = 11 : i64} {
  func.func @_dist_loss_kernel(%arg0: i32, %arg1: i32, %arg2: memref<1x8x128xf32, #tpu.memory_space<vmem>>, %arg3: memref<1x8x128xf32, #tpu.memory_space<vmem>>, %arg4: memref<1x8x128xf32, #tpu.memory_space<vmem>>, %arg5: memref<1x2x128xf32, #tpu.memory_space<vmem>>) attributes {dimension_semantics = [#tpu.dimension_semantics<parallel>, #tpu.dimension_semantics<arbitrary>], iteration_bounds = array<i64: 2, 1>, scalar_prefetch = 0 : i64, scratch_operands = 0 : i64, tpu.core_type = #tpu.core_type<tc>, window_params = [{transform_indices = @transform_0, window_bounds = array<i64: 1, 8, 128>}, {transform_indices = @transform_1, window_bounds = array<i64: 1, 8, 128>}, {transform_indices = @transform_2, window_bounds = array<i64: 1, 8, 128>}, {transform_indices = @transform_3, window_bounds = array<i64: 1, 2, 128>}]} {
    %c0_i32 = arith.constant 0 : i32
    %0 = arith.cmpi eq, %arg1, %c0_i32 : i32
    %1 = arith.extui %0 : i1 to i32
    %c0_i32_0 = arith.constant 0 : i32
    %2 = arith.cmpi ne, %1, %c0_i32_0 : i32
    scf.if %2 {
      %cst_21 = arith.constant 0.000000e+00 : f32
      %26 = vector.broadcast %cst_21 : f32 to vector<1x2x128xf32>
      %c0_22 = arith.constant 0 : index
      %c0_23 = arith.constant 0 : index
      %c0_24 = arith.constant 0 : index
      %27 = vector.load %arg5[%c0_22, %c0_23, %c0_24] : memref<1x2x128xf32, #tpu.memory_space<vmem>>, vector<1x2x128xf32>
      tpu.vector_store %arg5[%c0_22, %c0_23, %c0_24], %26 {strides = array<i32>} : memref<1x2x128xf32, #tpu.memory_space<vmem>>, vector<1x2x128xf32>,
    } else {
    }
    %c0 = arith.constant 0 : index
    %c0_1 = arith.constant 0 : index
    %c0_2 = arith.constant 0 : index
    %3 = vector.load %arg4[%c0, %c0_1, %c0_2] : memref<1x8x128xf32, #tpu.memory_space<vmem>>, vector<1x8x128xf32>
    %4 = vector.shape_cast %3 : vector<1x8x128xf32> to vector<8x128xf32>
    %c0_3 = arith.constant 0 : index
    %c0_4 = arith.constant 0 : index
    %c0_5 = arith.constant 0 : index
    %5 = vector.load %arg2[%c0_3, %c0_4, %c0_5] : memref<1x8x128xf32, #tpu.memory_space<vmem>>, vector<1x8x128xf32>
    %6 = vector.shape_cast %5 : vector<1x8x128xf32> to vector<8x128xf32>
    %c0_6 = arith.constant 0 : index
    %c0_7 = arith.constant 0 : index
    %c0_8 = arith.constant 0 : index
    %7 = vector.load %arg3[%c0_6, %c0_7, %c0_8] : memref<1x8x128xf32, #tpu.memory_space<vmem>>, vector<1x8x128xf32>
    %8 = vector.shape_cast %7 : vector<1x8x128xf32> to vector<8x128xf32>
    %9 = arith.subf %6, %8 : vector<8x128xf32>
    %10 = math.absf %9 : vector<8x128xf32>
    %c0_9 = arith.constant 0 : index
    %c0_10 = arith.constant 0 : index
    %c0_11 = arith.constant 0 : index
    %11 = vector.load %arg5[%c0_9, %c0_10, %c0_11] : memref<1x2x128xf32, #tpu.memory_space<vmem>>, vector<1x1x128xf32>
    %12 = vector.shape_cast %11 : vector<1x1x128xf32> to vector<128xf32>
    %13 = arith.mulf %4, %10 : vector<8x128xf32>
    %cst = arith.constant dense<0.000000e+00> : vector<128xf32>
    %14 = vector.multi_reduction <add>, %13, %cst [0] : vector<8x128xf32> to vector<128xf32>
    %15 = arith.addf %12, %14 : vector<128xf32>
    %c0_12 = arith.constant 0 : index
    %c0_13 = arith.constant 0 : index
    %c0_14 = arith.constant 0 : index
    %16 = vector.load %arg5[%c0_12, %c0_13, %c0_14] : memref<1x2x128xf32, #tpu.memory_space<vmem>>, vector<1x1x128xf32>
    %17 = vector.shape_cast %16 : vector<1x1x128xf32> to vector<128xf32>
    %18 = vector.shape_cast %15 : vector<128xf32> to vector<1x1x128xf32>
    tpu.vector_store %arg5[%c0_12, %c0_13, %c0_14], %18 {strides = array<i32>} : memref<1x2x128xf32, #tpu.memory_space<vmem>>, vector<1x1x128xf32>,
    %c0_15 = arith.constant 0 : index
    %c1 = arith.constant 1 : index
    %c0_16 = arith.constant 0 : index
    %19 = vector.load %arg5[%c0_15, %c1, %c0_16] : memref<1x2x128xf32, #tpu.memory_space<vmem>>, vector<1x1x128xf32>
    %20 = vector.shape_cast %19 : vector<1x1x128xf32> to vector<128xf32>
    %cst_17 = arith.constant dense<0.000000e+00> : vector<128xf32>
    %21 = vector.multi_reduction <add>, %4, %cst_17 [0] : vector<8x128xf32> to vector<128xf32>
    %22 = arith.addf %20, %21 : vector<128xf32>
    %c0_18 = arith.constant 0 : index
    %c1_19 = arith.constant 1 : index
    %c0_20 = arith.constant 0 : index
    %23 = vector.load %arg5[%c0_18, %c1_19, %c0_20] : memref<1x2x128xf32, #tpu.memory_space<vmem>>, vector<1x1x128xf32>
    %24 = vector.shape_cast %23 : vector<1x1x128xf32> to vector<128xf32>
    %25 = vector.shape_cast %22 : vector<128xf32> to vector<1x1x128xf32>
    tpu.vector_store %arg5[%c0_18, %c1_19, %c0_20], %25 {strides = array<i32>} : memref<1x2x128xf32, #tpu.memory_space<vmem>>, vector<1x1x128xf32>,
    return
  }
  func.func @transform_0(%arg0: i32, %arg1: i32) -> (i32, i32, i32) {
    %c0_i32 = arith.constant 0 : i32
    %c0_i32_0 = arith.constant 0 : i32
    return %arg0, %arg1, %c0_i32 : i32, i32, i32
  }
  func.func @transform_1(%arg0: i32, %arg1: i32) -> (i32, i32, i32) {
    %c0_i32 = arith.constant 0 : i32
    %c0_i32_0 = arith.constant 0 : i32
    return %arg0, %arg1, %c0_i32 : i32, i32, i32
  }
  func.func @transform_2(%arg0: i32, %arg1: i32) -> (i32, i32, i32) {
    %c0_i32 = arith.constant 0 : i32
    %c0_i32_0 = arith.constant 0 : i32
    return %arg0, %arg1, %c0_i32 : i32, i32, i32
  }
  func.func @transform_3(%arg0: i32, %arg1: i32) -> (i32, i32, i32) {
    %c0_i32 = arith.constant 0 : i32
    %c0_i32_0 = arith.constant 0 : i32
    %c0_i32_1 = arith.constant 0 : i32
    return %arg0, %c0_i32, %c0_i32_0 : i32, i32, i32
  }
}

</mosaic_0001>

<bundles_post_ra>
// kernel: tpu_custom_call.1
= control target key start
LH: loop header
LB: loop body
LE: loop exit
PB: predicated region body
PF: predicated region fallthrough
CT: control target
= control target key end

     0   :  { %s1007_s0 = inlined_call_operand.hbm [shape: f32[2,8,128], index: 0, kind: input, shape index: {}]   ;;  %s1008_s1 = inlined_call_operand.hbm [shape: f32[2,8,128], index: 1, kind: input, shape index: {}]   ;;  %s1009_s2 = inlined_call_operand.hbm [shape: f32[2,8,128], index: 2, kind: input, shape index: {}]   ;;  %s1010_s3 = inlined_call_operand.hbm [shape: f32[2,2,128], index: 3, kind: output, shape index: {}]  }
   0x1   :  { %1016 = sst [smem:[#allocation15_spill]] %s1008_s1 }
   0x2   :  { %8 = vsyncpa [#allocation3], 0 }
   0x3   :  { %10 = vsyncpa [#allocation3 + $0x1], 0 }
   0x4   :  { %11 = vsyncpa [#allocation6], 0 }
   0x5   :  { %13 = vsyncpa [#allocation6 + $0x1], 0 }
   0x6   :  { %14 = vsyncpa [#allocation4], 0 }
   0x7   :  { %16 = vsyncpa [#allocation4 + $0x1], 0  ;;  %s740_s12 = smov 0   ;;  %s742_s13 = smov 0  }
   0x8   :  { %s744_s14 = smov 0   ;;  %s746_s15 = smov 0  }
   0x9   :  { %s748_s16 = smov 0   ;;  %s750_s17 = smov 0  }
   0xa LB: > { %1017 = sst [smem:[#allocation12_spill]] %s709_s16  ;;  %s771_s18 = sadd.s32 4294967295, %s713_s17   ;;  %s713_s17 = sphi %s750_s17, %s22_s17   ;;  %s709_s16 = sphi %s748_s16, %s1038_s16   ;;  %s705_s15 = sphi %s746_s15, %s1037_s15   ;;  %s701_s14 = sphi %s744_s14, %s1041_s14   ;;  %s697_s13 = sphi %s742_s13, %s1040_s13   ;;  %s693_s12 = sphi %s740_s12, %s1039_s12  }
   0xb   : > { %s446_s19 = sadd.s32 4294967294, %s713_s17   ;;  %s34_s20 = sadd.s32 1, %s709_s16 }
   0xc   : > { %s43_s21 = sadd.s32 1, %s701_s14  ;;  %p36_p0 = scmp.ge.s32.totalorder %s34_s20, 2 }
   0xd   : > { %p50_p1 = scmp.ne.s32.totalorder %s701_s14, %s697_s13  ;;  %p51_p2 = scmp.eq.s32.totalorder %s713_s17, 0 }
   0xe   : > { %p56_p3 = scmp.ne.s32.totalorder %s697_s13, %s693_s12  ;;  %s1043_s20 = smov (%p36_p0, %s34_s20), 0 }
   0xf   : > { %1018 = sst [smem:[#allocation13_spill]] %s1043_s20  ;;  %p783_p4 = por %p51_p2, %p50_p1 }
  0x10   : > { %p57_p5 = scmp.eq.s32.totalorder %s771_s18, 0  ;;  %s38_s23 = ssub.s32 %s709_s16, %s1043_s20 }
  0x11   : > { %p136_p6 = scmp.eq.s32.totalorder %s771_s18, 1  ;;  %p41_p7 = scmp.eq.s32.totalorder %s38_s23, 0 }
  0x12   : > { %p791_p8 = por %p57_p5, %p56_p3  ;;  %p142_p10 = scmp.eq.s32.totalorder %s446_s19, 1 }
  0x13   : > { %p795_p9 = por %p136_p6, %p50_p1  ;;  %p486_p13 = scmp.lt.s32.totalorder %s713_s17, 2 }
  0x14   : > { %s1020_s24 = scalar_select %p791_p8, 1, 0 }
  0x15   : > { %s1021_s25 = scalar_select %p795_p9, 1, 0 }
  0x16   : > { %s800_s26 = scalar_select %p41_p7, %s701_s14, %s43_s21  }
  0x17   : > { %p802_p11 = por %p142_p10, %p56_p3  ;;  %s162_s28 = sand.u32 1, %s701_s14  }
  0x18   : > { %1022 = sst [smem:[#allocation14_spill]] %s800_s26  ;;  %s811_s29 = sshll.u32 %s162_s28, 3 }
  0x19   : > { %s1023_s27 = scalar_select %p802_p11, 1, 0 }
  0x1a   : > { %s814_s30 = sshll.u32 %s709_s16, 7  ;;  %p818_p0 = pnand %p486_p13, %p783_p4 }
  0x1b   : > { %s181_s5 = sand.u32 1, %s713_s17   ;;  %s1025_s1 = sld [smem:[#allocation15_spill]] }
  0x1c   : > { %s1024_s4 = scalar_select %p818_p0, 1, 0 }
  0x1d   : > { %s185_s9 = scalar_lea.vmem [#allocation5], %s811_s29  ;;  %s834_s11 = scalar_lea.sflag [#allocation6], %s181_s5 }
  0x1e   : > { %s193_s10 = sshll.u32 %s185_s9, 4  ;;  %p840_p4 = pneg %p818_p0  ;;  %s831_s10 = int_to_ptr.vmem [resolvable:$true] %s193_s10 }
  0x21   : > { %s827_s8 = scalar_lea.hbm %s1025_s1, %s814_s30  ;;  %s542_s6 = scalar_lea.hbm %s1025_s1, 256 }
  0x22   : > { %s537_s19 = scalar_lea.hbm %s827_s8, 128  ;;  %p543_p7 = scmp.lt.u32.totalorder %s827_s8, %s1025_s1 }
  0x23   : > { %p538_p3 = scmp.ne.s32.totalorder %s827_s8, %s537_s19  ;;  %p544_p10 = scmp.lt.u32.totalorder %s542_s6, %s537_s19 }
  0x24   : > { %p546_p12 = scmp.lt.u32.totalorder %s537_s19, %s827_s8 }
  0x25   : > { %p540_p5 = pnand %p840_p4, %p538_p3  ;;  %p545_p13 = por %p544_p10, %p543_p7 }
  0x27   : > { %p541_p6 = pneg %p540_p5  ;;  %p547_p1 = por %p546_p12, %p545_p13 }
  0x29   : > { %p548_p2 = pnand %p547_p1, %p541_p6 }
  0x2b   : > { %551 = shalt.err (!%p548_p2)
}
  0x2c   : > { %s552_s5 = scalar_lea.vmem %s831_s10, 128  ;;  %s715_s22 = smov [#allocation5]  }
  0x2d   : > { %p553_p3 = scmp.ne.s32.totalorder %s831_s10, %s552_s5  ;;  %s557_s23 = sshll.u32 %s715_s22, 4  ;;  %s558_s23 = int_to_ptr.vmem [resolvable:$false] %s557_s23 }
  0x2e   : > { %s559_s7 = scalar_lea.vmem %s558_s23, 256  ;;  %p560_p9 = scmp.lt.s32.totalorder %s831_s10, %s558_s23 }
  0x2f   : > { %p555_p5 = pnand %p553_p3, %p840_p4  ;;  %p561_p8 = scmp.lt.s32.totalorder %s559_s7, %s552_s5 }
  0x31   : > { %p556_p11 = pneg %p555_p5  ;;  %p562_p7 = por %p561_p8, %p560_p9 }
  0x33   : > { %p563_p10 = pnand %p562_p7, %p556_p11 }
  0x35   : > { %566 = shalt.err (!%p563_p10)
}
  0x36   : > { %478 = dma.hbm_to_vmem [thread:$0]  (!%p818_p0), %s827_s8, 128, %s831_s10, %s834_s11  }
  0x37   : > { %p1027_p12 = scmp.lt.s32.totalorder %s713_s17, 3  ;;  %p1028_p1 = scmp.ge.s32.totalorder %s713_s17, 1 }
  0x38   : > { %s876_s5 = scalar_lea.hbm %s1007_s0, %s814_s30  ;;  %s166_s22 = scalar_lea.vmem [#allocation2], %s811_s29 }
  0x39   : > { %p868_p2 = pnand %p1028_p1, %p1027_p12  ;;  %s174_s23 = sshll.u32 %s166_s22, 4  ;;  %s879_s23 = int_to_ptr.vmem [resolvable:$true] %s174_s23 }
  0x3a   : > { %s885_s7 = scalar_lea.hbm %s1009_s2, %s814_s30  ;;  %s163_s1 = scalar_lea.sflag [#allocation3], %s162_s28 }
  0x3b   : > { %s1029_s19 = scalar_select %p868_p2, 1, 0 }
  0x3c   : > { %s567_s20 = scalar_lea.hbm %s876_s5, 128  ;;  %s572_s16 = scalar_lea.hbm %s1007_s0, 256 }
  0x3d   : > { %p568_p8 = scmp.ne.s32.totalorder %s876_s5, %s567_s20  ;;  %p573_p6 = scmp.lt.u32.totalorder %s876_s5, %s1007_s0 }
  0x3e   : > { %p574_p13 = scmp.lt.u32.totalorder %s572_s16, %s567_s20  ;;  %p576_p5 = scmp.lt.u32.totalorder %s567_s20, %s876_s5 }
  0x3f   : > { %p570_p9 = pnand %p568_p8, %p840_p4 }
  0x40   : > { %p575_p3 = por %p574_p13, %p573_p6 }
  0x41   : > { %p571_p11 = pneg %p570_p9 }
  0x42   : > { %p577_p7 = por %p576_p5, %p575_p3 }
  0x44   : > { %p578_p10 = pnand %p577_p7, %p571_p11 }
  0x46   : > { %581 = shalt.err (!%p578_p10)
}
  0x47   : > { %s582_s28 = scalar_lea.vmem %s879_s23, 128  ;;  %s716_s30 = smov [#allocation2]  }
  0x48   : > { %p583_p12 = scmp.ne.s32.totalorder %s879_s23, %s582_s28  ;;  %s587_s8 = sshll.u32 %s716_s30, 4  ;;  %s588_s8 = int_to_ptr.vmem [resolvable:$false] %s587_s8 }
  0x49   : > { %s589_s26 = scalar_lea.vmem %s588_s8, 256  ;;  %p590_p9 = scmp.lt.s32.totalorder %s879_s23, %s588_s8 }
  0x4a   : > { %p585_p1 = pnand %p583_p12, %p840_p4  ;;  %p591_p2 = scmp.lt.s32.totalorder %s589_s26, %s582_s28 }
  0x4c   : > { %p586_p8 = pneg %p585_p1  ;;  %p592_p6 = por %p591_p2, %p590_p9 }
  0x4e   : > { %p593_p13 = pnand %p592_p6, %p586_p8 }
  0x50   : > { %596 = shalt.err (!%p593_p13)
}
  0x51   : > { %475 = dma.hbm_to_vmem [thread:$0]  (!%p818_p0), %s876_s5, 128, %s879_s23, %s163_s1  }
  0x52   : > { %s204_s16 = scalar_lea.vmem [#allocation7], %s811_s29  ;;  %s597_s10 = scalar_lea.hbm %s885_s7, 128 }
  0x53   : > { %s212_s20 = sshll.u32 %s204_s16, 4  ;;  %p598_p11 = scmp.ne.s32.totalorder %s885_s7, %s597_s10  ;;  %s213_s20 = int_to_ptr.vmem [resolvable:$true] %s212_s20 }
  0x54   : > { %s602_s22 = scalar_lea.hbm %s1009_s2, 256  ;;  %p603_p5 = scmp.lt.u32.totalorder %s885_s7, %s1009_s2 }
  0x55   : > { %p600_p2 = pnand %p598_p11, %p840_p4  ;;  %p604_p7 = scmp.lt.u32.totalorder %s602_s22, %s597_s10 }
  0x56   : > { %p606_p12 = scmp.lt.u32.totalorder %s597_s10, %s885_s7 }
  0x57   : > { %p601_p3 = pneg %p600_p2  ;;  %p605_p10 = por %p604_p7, %p603_p5 }
  0x59   : > { %p607_p1 = por %p606_p12, %p605_p10 }
  0x5b   : > { %p608_p8 = pnand %p607_p1, %p601_p3 }
  0x5d   : > { %611 = shalt.err (!%p608_p8)
}
  0x5e   : > { %s612_s1 = scalar_lea.vmem %s213_s20, 128  ;;  %s717_s29 = smov [#allocation7]  }
  0x5f   : > { %p613_p9 = scmp.ne.s32.totalorder %s213_s20, %s612_s1  ;;  %s617_s5 = sshll.u32 %s717_s29, 4  ;;  %s618_s5 = int_to_ptr.vmem [resolvable:$false] %s617_s5 }
  0x60   : > { %s619_s23 = scalar_lea.vmem %s618_s5, 256  ;;  %p620_p11 = scmp.lt.s32.totalorder %s213_s20, %s618_s5 }
  0x61   : > { %p615_p6 = pnand %p613_p9, %p840_p4  ;;  %p621_p2 = scmp.lt.s32.totalorder %s619_s23, %s612_s1 }
  0x63   : > { %p616_p13 = pneg %p615_p6  ;;  %p622_p0 = por %p621_p2, %p620_p11 }
  0x65   : > { %p623_p5 = pnand %p622_p0, %p616_p13 }
  0x67   : > { %626 = shalt.err (!%p623_p5)
}
  0x68   : > { %p1030_p7 = scmp.ne.s32.totalorder %s1024_s4, 0  ;;  %p1031_p3 = scmp.ne.s32.totalorder %s1029_s19, 0 }
  0x69   : > { %s932_s21 = sand.u32 (!%p1031_p3), 1, %s697_s13   ;;  %p1032_p4 = scmp.ne.s32.totalorder (!%p1031_p3), %s1020_s24, 0 }
  0x6a   : > { %481 = dma.hbm_to_vmem [thread:$0]  (!%p1030_p7), %s885_s7, 128, %s213_s20, %s834_s11  }
  0x6b   : > { %221 = sbr.rel (%p1031_p3) target bundleno = 153 (0x99), region = 32  ;;  %s456_s8 = sshll.u32 (!%p1031_p3), %s932_s21, 3 }
  0x6c   : > { %s224_s26 = scalar_lea.sflag (!%p1031_p3), [#allocation3], %s932_s21  ;;  %s227_s16 = scalar_lea.vmem (!%p1031_p3), [#allocation2], %s456_s8 }
  0x72   : > { %680 = dma.done.wait (%p1032_p4), %s224_s26, 128  }
  0x73   : > { %682 = vsyncadd (%p1032_p4), %s224_s26, 4294967168  ;;  %s232_s4 = sand.u32 1, %s771_s18   ;;  %s236_s19 = scalar_lea.vmem [#allocation5], %s456_s8 }
  0x74   : > { %s233_s11 = scalar_lea.sflag [#allocation6], %s232_s4 }
  0x75   : > { %684 = dma.done.wait (%p1032_p4), %s233_s11, 256  }
  0x76   : > { %686 = vsyncadd (%p1032_p4), %s233_s11, 4294967040  ;;  %s459_s7 = sshll.u32 %s932_s21, 1  ;;  %v718_v0 = vmov 0.0   ;;  %s245_s10 = scalar_lea.vmem [#allocation7], %s456_s8  ;;  %v284_v2 = vld [vmem:[%s227_s16] sm:$0xff]  ;;  %v285_v3 = vld [vmem:[%s236_s19] sm:$0xff] }
  0x77   : > { %s946_s20 = scalar_lea.vmem [#allocation8], %s459_s7  ;;  %v283_v1 = vld [vmem:[%s245_s10] sm:$0xff]  ;;  %v286_v4 = vsub.f32 %v284_v2, %v285_v3  ;;  %s461_s18 = sshll.u32 %s705_s15, 5 }
  0x78   : > { %282 = vst [vmem:[%s946_s20] sm:$0x3] %v718_v0  ;;  %v299_v5 = vrot.slane %v283_v1, 4  ;;  %s321_s24 = sshll.u32 %s946_s20, 4  ;;  %s957_s22 = scalar_lea.hbm %s1010_s3, %s461_s18  ;;  %s959_s24 = int_to_ptr.vmem [resolvable:$true] %s321_s24 }
  0x79   : > { %v287_v6 = vand.u32 2147483647, %v286_v4  ;;  %s308_s28 = scalar_lea.sflag [#allocation4], %s932_s21  ;;  %s627_s30 = scalar_lea.vmem %s959_s24, 32 }
  0x7a   : > { %v300_v7 = vadd.f32 %v299_v5, %v283_v1  ;;  %p628_p0 = scmp.ne.s32.totalorder %s959_s24, %s627_s30  ;;  %p1033_p10 = scmp.ne.s32.totalorder %s1021_s25, 0 }
  0x7b   : > { %v289_v8 = vmul.f32 %v287_v6, %v283_v1  ;;  %s719_s15 = smov [#allocation8]  }
  0x7c   : > { %v301_v9 = vrot.slane %v300_v7, 2  ;;  %p629_p12 = pnand %p628_p0, %p1033_p10  ;;  %s631_s1 = sshll.u32 %s719_s15, 4  ;;  %s632_s1 = int_to_ptr.vmem [resolvable:$false] %s631_s1 }
  0x7d   : > { %v290_v10 = vrot.slane %v289_v8, 4  ;;  %s633_s29 = scalar_lea.vmem %s632_s1, 64  ;;  %p634_p8 = scmp.lt.s32.totalorder %s959_s24, %s632_s1 }
  0x7e   : > { %v302_v11 = vadd.f32 %v301_v9, %v300_v7  ;;  %p630_p1 = pneg %p629_p12  ;;  %p635_p9 = scmp.lt.s32.totalorder %s633_s29, %s627_s30 }
  0x7f   : > { %v291_v12 = vadd.f32 %v290_v10, %v289_v8  ;;  %v298_v14 = vld [vmem:[%s946_s20 + $0x1] sm:$0x1]  ;;  %v288_v20 = vld [vmem:[%s946_s20] sm:$0x1] }
  0x80   : > { %v303_v13 = vrot.slane %v302_v11, 1  ;;  %p636_p6 = por %p635_p9, %p634_p8 }
  0x81   : > { %v292_v15 = vrot.slane %v291_v12, 2 }
  0x82   : > { %v304_v16 = vadd.f32 %v303_v13, %v302_v11  ;;  %p637_p13 = pnand %p636_p6, %p630_p1 }
  0x83   : > { %v293_v17 = vadd.f32 %v292_v15, %v291_v12 }
  0x84   : > { %v305_v18 = vadd.f32 %v304_v16, %v298_v14 }
  0x85   : > { %v294_v19 = vrot.slane %v293_v17, 1 }
  0x86   : > { %306 = vst [vmem:[%s946_s20 + $0x1] sm:$0x1] %v305_v18 }
  0x87   : > { %v295_v21 = vadd.f32 %v294_v19, %v293_v17 }
  0x89   : > { %v296_v22 = vadd.f32 %v295_v21, %v288_v20 }
  0x8b   : > { %297 = vst [vmem:[%s946_s20] sm:$0x1] %v296_v22 }
  0x8c   : > { %640 = shalt.err (!%p637_p13)
}
  0x8d   : > { %s641_s5 = scalar_lea.hbm %s957_s22, 32  ;;  %s645_s8 = scalar_lea.hbm %s1010_s3, 64 }
  0x8e   : > { %p642_p11 = scmp.ne.s32.totalorder %s957_s22, %s641_s5  ;;  %p646_p7 = scmp.lt.u32.totalorder %s957_s22, %s1010_s3 }
  0x8f   : > { %p647_p3 = scmp.lt.u32.totalorder %s645_s8, %s641_s5  ;;  %p649_p0 = scmp.lt.u32.totalorder %s641_s5, %s957_s22 }
  0x90   : > { %p643_p2 = pnand %p642_p11, %p1033_p10 }
  0x91   : > { %p648_p4 = por %p647_p3, %p646_p7 }
  0x92   : > { %p644_p5 = pneg %p643_p2 }
  0x93   : > { %p650_p12 = por %p649_p0, %p648_p4 }
  0x95   : > { %p651_p1 = pnand %p650_p12, %p644_p5 }
  0x97   : > { %654 = shalt.err (!%p651_p1)
}
  0x98   : > { %470 = dma.vmem_to_hbm [thread:$0]  (%p1033_p10), %s959_s24, 32, %s957_s22, %s308_s28  }
  0x99 PF: > { %s333_s4 = sand.u32 1, %s693_s12   ;;  %p1034_p8 = scmp.ne.s32.totalorder %s1023_s27, 0 }
  0x9a   : > { %p1035_p9 = scmp.ge.s32.totalorder %s713_s17, 2  ;;  %s334_s11 = scalar_lea.sflag [#allocation4], %s333_s4 }
  0x9c   : > { %p483_p6 = pnand %p1035_p9, %p1034_p8 }
  0x9e   : > { %688 = dma.done.wait (!%p483_p6), %s334_s11, 32  }
  0x9f   : > { %690 = vsyncadd (!%p483_p6), %s334_s11, 4294967264  ;;  %s22_s17 = sadd.s32 1, %s713_s17   ;;  %s1036_s25 = sld [smem:[#allocation14_spill]] }
  0xa0   : > { %p19_p13 = scmp.ge.s32.totalorder %s22_s17, 4   ;;  %s1037_s15 = sld [smem:[#allocation12_spill]] }
  0xa1   : > { %s1038_s16 = sld [smem:[#allocation13_spill]]  ;;  %s1039_s12 = smov %s697_s13 }
  0xa2   : > { %s1040_s13 = smov %s701_s14  ;;  %21 = sbr.rel (!%p19_p13) target bundleno = 10 (0xa), region = 105 }
  0xa5   : > { %s1041_s14 = smov %s1036_s25 }
  0xa9   :  { %339 = vsyncpa [#allocation3], 1 }
  0xaa   :  { %341 = vsyncpa [#allocation3 + $0x1], 1 }
  0xab   :  { %342 = vsyncpa [#allocation6], 1 }
  0xac   :  { %344 = vsyncpa [#allocation6 + $0x1], 1 }
  0xad   :  { %345 = vsyncpa [#allocation4], 1 }
  0xae   :  { %347 = vsyncpa [#allocation4 + $0x1], 1 }

</bundles_post_ra>
